<compile_context>
chip_gen: v5e
topology: v5e:2x2
jax: 0.10.0
libtpu: 0.0.40
codegen_flags: <defaults>
</compile_context>

<pallas_src>
import jax
import jax.numpy as jnp
from jax.experimental import pallas as pl
from jax.experimental.pallas import tpu as pltpu


LANE = 128


def _round_up(v, m=LANE):
    return ((v + m - 1) // m) * m


# ----------------------------------------------------------------------------
# Fused kernel: 4 chained GCN layers, everything VMEM-resident.
# ----------------------------------------------------------------------------
def fused_gae_gcn_kernel(a_ref, x_ref,
                         w1_ref, b1_ref, w2_ref, b2_ref,
                         w3_ref, b3_ref, w4_ref, b4_ref,
                         emb_ref, rec_ref):
    """emb = conv3(conv2(conv1(x))), rec = decoder(emb); each layer is
    tanh(A @ (h @ W) + b).  All operands live in VMEM; intermediates stay
    on-chip between layers (no HBM round-trips)."""
    a = a_ref[...]
    h = x_ref[...]

    def layer(h, w_ref, b_ref):
        xw = jnp.dot(h, w_ref[...], preferred_element_type=jnp.float32)
        agg = jnp.dot(a, xw, preferred_element_type=jnp.float32)
        return jnp.tanh(agg + b_ref[...])

    h = layer(h, w1_ref, b1_ref)      # conv1
    h = layer(h, w2_ref, b2_ref)      # conv2
    h = layer(h, w3_ref, b3_ref)      # conv3 -> embedding
    emb_ref[...] = h
    h = layer(h, w4_ref, b4_ref)      # decoder -> reconstruction
    rec_ref[...] = h


# ----------------------------------------------------------------------------
# Plain-JAX graph glue
# ----------------------------------------------------------------------------
def build_norm_adj(edge_index, edge_attr, num_nodes):
    """Dense equivalent of PyG gcn_norm with add_self_loops=True."""
    w = jnp.squeeze(edge_attr).astype(jnp.float32)
    adj = jnp.zeros((num_nodes, num_nodes), jnp.float32)
    # A[i, j] accumulates weights of edges j -> i (row = dst, col = src).
    adj = adj.at[edge_index[1], edge_index[0]].add(w)
    adj = adj + jnp.eye(num_nodes, dtype=jnp.float32)      # self loops, weight 1
    deg = adj.sum(axis=1)                                   # weighted in-degree
    dinv = jnp.where(deg > 0, 1.0 / jnp.sqrt(deg), 0.0)
    return dinv[:, None] * adj * dinv[None, :]


def glorot(key, fan_in, fan_out):
    limit = (6.0 / (fan_in + fan_out)) ** 0.5
    return jax.random.uniform(key, (fan_in, fan_out), jnp.float32, -limit, limit)


def init_gae_gcn_params(key, hidden_dim):
    # Layer dims hard-coded in the module: hidden -> 200 -> 200 -> 150 -> hidden
    dims = [(hidden_dim, 200), (200, 200), (200, 150), (150, hidden_dim)]
    params = []
    for d_in, d_out in dims:
        key, sub = jax.random.split(key)
        w = glorot(sub, d_in, d_out)
        b = jnp.zeros((1, d_out), jnp.float32)   # PyG GCNConv bias is zero-init
        params.append((w, b))
    return params


def _pad2d(x, rows, cols):
    r, c = x.shape
    return jnp.pad(x, ((0, rows - r), (0, cols - c)))


# ----------------------------------------------------------------------------
# Wrapper: pad features to lane multiples, run the single fused kernel, slice.
# ----------------------------------------------------------------------------
def gae_gcn_forward(x, edge_index, edge_attr, params):
    """Returns (x_embed, recon_x) exactly like GAE_GCN.forward."""
    n, d_in = x.shape
    a_norm = build_norm_adj(edge_index, edge_attr, n)

    # Feature dims through the stack and their 128-padded versions.
    dims = [d_in] + [w.shape[1] for (w, _) in params]        # [32, 200, 200, 150, 32]
    pdims = [_round_up(d) for d in dims]                     # [128, 256, 256, 256, 128]

    x_p = _pad2d(x, n, pdims[0])
    padded = []
    for (w, b), pi, po in zip(params, pdims[:-1], pdims[1:]):
        padded.append(_pad2d(w, pi, po))
        padded.append(_pad2d(b, 1, po))

    vmem_spec = pl.BlockSpec(memory_space=pltpu.MemorySpace.VMEM)
    emb_p, rec_p = pl.pallas_call(
        fused_gae_gcn_kernel,
        out_shape=(
            jax.ShapeDtypeStruct((n, pdims[3]), jnp.float32),   # conv3 output (padded)
            jax.ShapeDtypeStruct((n, pdims[4]), jnp.float32),   # decoder output (padded)
        ),
        in_specs=[vmem_spec] * (2 + len(padded)),
        out_specs=(vmem_spec, vmem_spec),
    )(a_norm, x_p, *padded)

    # Slice the zero padding back off.
    return emb_p[:, : dims[3]], rec_p[:, : dims[4]]


def gae_gcn_forward_ref(x, edge_index, edge_attr, params):
    """Plain-JAX reference (highest matmul precision) for correctness checks."""
    n = x.shape[0]
    a_norm = build_norm_adj(edge_index, edge_attr, n)
    hi = jax.lax.Precision.HIGHEST
    h = x
    outs = []
    for (w, b) in params:
        xw = jnp.dot(h, w, precision=hi)
        h = jnp.tanh(jnp.dot(a_norm, xw, precision=hi) + b)
        outs.append(h)
    return outs[2], outs[3]


# TODO(synk): loss_gae / caculate_ad_score are host-side per-graph loss loops
# (boolean masking, python max/index), not part of forward(); not ported.

if __name__ == "__main__":
    hidden_dim = 32     # small "hidden_dim" for the synthetic run
    num_nodes = 16
    num_edges = 40

    key = jax.random.PRNGKey(0)
    k_x, k_src, k_dst, k_w, k_par = jax.random.split(key, 5)

    x = jax.random.normal(k_x, (num_nodes, hidden_dim), jnp.float32)
    src = jax.random.randint(k_src, (num_edges,), 0, num_nodes, jnp.int32)
    dst = jax.random.randint(k_dst, (num_edges,), 0, num_nodes, jnp.int32)
    edge_index = jnp.stack([src, dst], axis=0)                       # (2, E)
    edge_attr = jax.random.uniform(k_w, (num_edges, 1), jnp.float32,
                                   0.1, 1.0)                         # squeezed in forward

    params = init_gae_gcn_params(k_par, hidden_dim)

    x_embed, recon_x = gae_gcn_forward(x, edge_index, edge_attr, params)
    jax.block_until_ready((x_embed, recon_x))

    x_ref, recon_ref = gae_gcn_forward_ref(x, edge_index, edge_attr, params)
    assert x_embed.shape == (num_nodes, 150), x_embed.shape
    assert recon_x.shape == (num_nodes, hidden_dim), recon_x.shape
    assert jnp.allclose(x_embed, x_ref, atol=2e-4, rtol=2e-4)
    assert jnp.allclose(recon_x, recon_ref, atol=2e-4, rtol=2e-4)

    print("KERNEL_OK")
</pallas_src>

<mosaic_0001>
module attributes {stable_mosaic.version = 11 : i64} {
  func.func @fused_gae_gcn_kernel(%arg0: memref<16x16xf32, #tpu.memory_space<vmem>>, %arg1: memref<16x128xf32, #tpu.memory_space<vmem>>, %arg2: memref<128x256xf32, #tpu.memory_space<vmem>>, %arg3: memref<1x256xf32, #tpu.memory_space<vmem>>, %arg4: memref<256x256xf32, #tpu.memory_space<vmem>>, %arg5: memref<1x256xf32, #tpu.memory_space<vmem>>, %arg6: memref<256x256xf32, #tpu.memory_space<vmem>>, %arg7: memref<1x256xf32, #tpu.memory_space<vmem>>, %arg8: memref<256x128xf32, #tpu.memory_space<vmem>>, %arg9: memref<1x128xf32, #tpu.memory_space<vmem>>, %arg10: memref<16x256xf32, #tpu.memory_space<vmem>>, %arg11: memref<16x128xf32, #tpu.memory_space<vmem>>) attributes {dimension_semantics = [], scalar_prefetch = 0 : i64, scratch_operands = 0 : i64, tpu.core_type = #tpu.core_type<tc>} {
    %c0 = arith.constant 0 : index
    %c0_0 = arith.constant 0 : index
    %0 = vector.load %arg0[%c0, %c0_0] : memref<16x16xf32, #tpu.memory_space<vmem>>, vector<16x16xf32>
    %c0_1 = arith.constant 0 : index
    %c0_2 = arith.constant 0 : index
    %1 = vector.load %arg1[%c0_1, %c0_2] : memref<16x128xf32, #tpu.memory_space<vmem>>, vector<16x128xf32>
    %c0_3 = arith.constant 0 : index
    %c0_4 = arith.constant 0 : index
    %2 = vector.load %arg2[%c0_3, %c0_4] : memref<128x256xf32, #tpu.memory_space<vmem>>, vector<128x256xf32>
    %cst = arith.constant dense<0.000000e+00> : vector<16x256xf32>
    %3 = tpu.matmul %1, %2, %cst {dimension_numbers = #tpu.dot_dimension_numbers<[1], [0], [0], [1], [0, 0, 1, 1], [], []>} : vector<16x128xf32>, vector<128x256xf32>, vector<16x256xf32> -> vector<16x256xf32>
    %cst_5 = arith.constant dense<0.000000e+00> : vector<16x256xf32>
    %4 = tpu.matmul %0, %3, %cst_5 {dimension_numbers = #tpu.dot_dimension_numbers<[1], [0], [0], [1], [0, 0, 1, 1], [], []>} : vector<16x16xf32>, vector<16x256xf32>, vector<16x256xf32> -> vector<16x256xf32>
    %c0_6 = arith.constant 0 : index
    %c0_7 = arith.constant 0 : index
    %5 = vector.load %arg3[%c0_6, %c0_7] : memref<1x256xf32, #tpu.memory_space<vmem>>, vector<1x256xf32>
    %6 = vector.broadcast %5 : vector<1x256xf32> to vector<16x256xf32>
    %7 = arith.addf %4, %6 : vector<16x256xf32>
    %8 = math.tanh %7 : vector<16x256xf32>
    %c0_8 = arith.constant 0 : index
    %c0_9 = arith.constant 0 : index
    %9 = vector.load %arg4[%c0_8, %c0_9] : memref<256x256xf32, #tpu.memory_space<vmem>>, vector<256x256xf32>
    %cst_10 = arith.constant dense<0.000000e+00> : vector<16x256xf32>
    %10 = tpu.matmul %8, %9, %cst_10 {dimension_numbers = #tpu.dot_dimension_numbers<[1], [0], [0], [1], [0, 0, 1, 1], [], []>} : vector<16x256xf32>, vector<256x256xf32>, vector<16x256xf32> -> vector<16x256xf32>
    %cst_11 = arith.constant dense<0.000000e+00> : vector<16x256xf32>
    %11 = tpu.matmul %0, %10, %cst_11 {dimension_numbers = #tpu.dot_dimension_numbers<[1], [0], [0], [1], [0, 0, 1, 1], [], []>} : vector<16x16xf32>, vector<16x256xf32>, vector<16x256xf32> -> vector<16x256xf32>
    %c0_12 = arith.constant 0 : index
    %c0_13 = arith.constant 0 : index
    %12 = vector.load %arg5[%c0_12, %c0_13] : memref<1x256xf32, #tpu.memory_space<vmem>>, vector<1x256xf32>
    %13 = vector.broadcast %12 : vector<1x256xf32> to vector<16x256xf32>
    %14 = arith.addf %11, %13 : vector<16x256xf32>
    %15 = math.tanh %14 : vector<16x256xf32>
    %c0_14 = arith.constant 0 : index
    %c0_15 = arith.constant 0 : index
    %16 = vector.load %arg6[%c0_14, %c0_15] : memref<256x256xf32, #tpu.memory_space<vmem>>, vector<256x256xf32>
    %cst_16 = arith.constant dense<0.000000e+00> : vector<16x256xf32>
    %17 = tpu.matmul %15, %16, %cst_16 {dimension_numbers = #tpu.dot_dimension_numbers<[1], [0], [0], [1], [0, 0, 1, 1], [], []>} : vector<16x256xf32>, vector<256x256xf32>, vector<16x256xf32> -> vector<16x256xf32>
    %cst_17 = arith.constant dense<0.000000e+00> : vector<16x256xf32>
    %18 = tpu.matmul %0, %17, %cst_17 {dimension_numbers = #tpu.dot_dimension_numbers<[1], [0], [0], [1], [0, 0, 1, 1], [], []>} : vector<16x16xf32>, vector<16x256xf32>, vector<16x256xf32> -> vector<16x256xf32>
    %c0_18 = arith.constant 0 : index
    %c0_19 = arith.constant 0 : index
    %19 = vector.load %arg7[%c0_18, %c0_19] : memref<1x256xf32, #tpu.memory_space<vmem>>, vector<1x256xf32>
    %20 = vector.broadcast %19 : vector<1x256xf32> to vector<16x256xf32>
    %21 = arith.addf %18, %20 : vector<16x256xf32>
    %22 = math.tanh %21 : vector<16x256xf32>
    %c0_20 = arith.constant 0 : index
    %c0_21 = arith.constant 0 : index
    %23 = vector.load %arg10[%c0_20, %c0_21] : memref<16x256xf32, #tpu.memory_space<vmem>>, vector<16x256xf32>
    tpu.vector_store %arg10[%c0_20, %c0_21], %22 {strides = array<i32>} : memref<16x256xf32, #tpu.memory_space<vmem>>, vector<16x256xf32>,
    %c0_22 = arith.constant 0 : index
    %c0_23 = arith.constant 0 : index
    %24 = vector.load %arg8[%c0_22, %c0_23] : memref<256x128xf32, #tpu.memory_space<vmem>>, vector<256x128xf32>
    %cst_24 = arith.constant dense<0.000000e+00> : vector<16x128xf32>
    %25 = tpu.matmul %22, %24, %cst_24 {dimension_numbers = #tpu.dot_dimension_numbers<[1], [0], [0], [1], [0, 0, 1, 1], [], []>} : vector<16x256xf32>, vector<256x128xf32>, vector<16x128xf32> -> vector<16x128xf32>
    %cst_25 = arith.constant dense<0.000000e+00> : vector<16x128xf32>
    %26 = tpu.matmul %0, %25, %cst_25 {dimension_numbers = #tpu.dot_dimension_numbers<[1], [0], [0], [1], [0, 0, 1, 1], [], []>} : vector<16x16xf32>, vector<16x128xf32>, vector<16x128xf32> -> vector<16x128xf32>
    %c0_26 = arith.constant 0 : index
    %c0_27 = arith.constant 0 : index
    %27 = vector.load %arg9[%c0_26, %c0_27] : memref<1x128xf32, #tpu.memory_space<vmem>>, vector<1x128xf32>
    %28 = vector.broadcast %27 : vector<1x128xf32> to vector<16x128xf32>
    %29 = arith.addf %26, %28 : vector<16x128xf32>
    %30 = math.tanh %29 : vector<16x128xf32>
    %c0_28 = arith.constant 0 : index
    %c0_29 = arith.constant 0 : index
    %31 = vector.load %arg11[%c0_28, %c0_29] : memref<16x128xf32, #tpu.memory_space<vmem>>, vector<16x128xf32>
    tpu.vector_store %arg11[%c0_28, %c0_29], %30 {strides = array<i32>} : memref<16x128xf32, #tpu.memory_space<vmem>>, vector<16x128xf32>,
    return
  }
}

</mosaic_0001>

<bundles_post_ra>
// kernel: tpu_custom_call.1
= control target key start
LH: loop header
LB: loop body
LE: loop exit
PB: predicated region body
PF: predicated region fallthrough
CT: control target
= control target key end

     0   :  { %17 = vsyncpa [#allocation3], 0  ;;  %s1294_s0 = inlined_call_operand.hbm [shape: f32[16,16], index: 0, kind: input, shape index: {}]   ;;  %s1295_s1 = inlined_call_operand.hbm [shape: f32[16,128], index: 1, kind: input, shape index: {}]   ;;  %s1296_s2 = inlined_call_operand.hbm [shape: f32[128,256], index: 2, kind: input, shape index: {}]   ;;  %s1297_s3 = inlined_call_operand.vmem [shape: f32[1,256], index: 3, kind: input, shape index: {}]   ;;  %s1298_s4 = inlined_call_operand.hbm [shape: f32[256,256], index: 4, kind: input, shape index: {}]   ;;  %s1299_s5 = inlined_call_operand.vmem [shape: f32[1,256], index: 5, kind: input, shape index: {}]   ;;  %s1300_s6 = inlined_call_operand.hbm [shape: f32[256,256], index: 6, kind: input, shape index: {}]   ;;  %s1301_s7 = inlined_call_operand.vmem [shape: f32[1,256], index: 7, kind: input, shape index: {}]   ;;  %s1302_s8 = inlined_call_operand.hbm [shape: f32[256,128], index: 8, kind: input, shape index: {}]   ;;  %s1303_s9 = inlined_call_operand.vmem [shape: f32[1,128], index: 9, kind: input, shape index: {}]   ;;  %s1304_s10 = inlined_call_operand.hbm [shape: f32[16,256], index: 10, kind: output, shape index: {0}]   ;;  %s1305_s11 = inlined_call_operand.hbm [shape: f32[16,128], index: 11, kind: output, shape index: {1}]  }
   0x1   :  { %18 = vsyncpa [#allocation6], 0 }
   0x2   :  { %19 = vsyncpa [#allocation9], 0 }
   0x3   :  { %20 = vsyncpa [#allocation12], 0 }
   0x4   :  { %21 = vsyncpa [#allocation4], 0 }
   0x5   :  { %22 = vsyncpa [#allocation15], 0  ;;  %s40_s19 = sshll.u32 %s1295_s1, 4  ;;  %s1130_s20 = smov [#allocation5]   ;;  %s41_s19 = int_to_ptr.hbm [resolvable:$true] %s40_s19 }
   0x6   :  { %s42_s21 = sshll.u32 %s1130_s20, 4  ;;  %s1131_s22 = smov 128   ;;  %s43_s21 = int_to_ptr.vmem [resolvable:$true] %s42_s21 }
   0x7   :  { %s1132_s23 = smov 8   ;;  %s68_s26 = sshll.u32 %s1298_s4, 4  ;;  %s69_s26 = int_to_ptr.hbm [resolvable:$true] %s68_s26 }
   0x8   :  { %48 = dma.hbm_to_vmem [thread:$0]  %s41_s19, 256, %s43_s21, [#allocation6], %s1131_s22, %s1131_s22, %s1132_s23  }
   0x9   :  { %s1133_s27 = smov [#allocation8]   ;;  %s27_s1 = sshll.u32 %s1294_s0, 4  ;;  %s28_s1 = int_to_ptr.hbm [resolvable:$true] %s27_s1 }
   0xa   :  { %s70_s28 = sshll.u32 %s1133_s27, 4  ;;  %s1134_s12 = smov 256   ;;  %s71_s28 = int_to_ptr.vmem [resolvable:$true] %s70_s28 }
   0xb   :  { %s1135_s13 = smov 16   ;;  %s53_s16 = sshll.u32 %s1296_s2, 4  ;;  %s54_s16 = int_to_ptr.hbm [resolvable:$true] %s53_s16 }
   0xc   :  { %76 = dma.hbm_to_vmem [thread:$0]  %s69_s26, 8192, %s71_s28, [#allocation9], %s1134_s12, %s1134_s12, %s1135_s13  }
   0xd   :  { %s1136_s4 = smov [#allocation2]   ;;  %s1137_s0 = smov [#allocation7]  }
   0xe   :  { %s29_s17 = sshll.u32 %s1136_s4, 4  ;;  %s55_s18 = sshll.u32 %s1137_s0, 4  ;;  %s30_s17 = int_to_ptr.vmem [resolvable:$true] %s29_s17  ;;  %s56_s18 = int_to_ptr.vmem [resolvable:$true] %s55_s18 }
   0xf   :  { %35 = dma.hbm_to_vmem [thread:$0]  %s28_s1, 256, %s30_s17, [#allocation3], %s1131_s22, %s1131_s22, %s1132_s23  }
  0x10   :  { %s83_s21 = sshll.u32 %s1300_s6, 4  ;;  %s98_s25 = sshll.u32 %s1302_s8, 4  ;;  %s84_s21 = int_to_ptr.hbm [resolvable:$true] %s83_s21  ;;  %s99_s25 = int_to_ptr.hbm [resolvable:$true] %s98_s25 }
  0x11   :  { %61 = dma.hbm_to_vmem [thread:$0]  %s54_s16, 4096, %s56_s18, [#allocation6], %s1134_s12, %s1134_s12, %s1135_s13  }
  0x12   :  { %s1138_s26 = smov [#allocation10]   ;;  %s1139_s28 = smov [#allocation11]  }
  0x13   :  { %s85_s27 = sshll.u32 %s1138_s26, 4  ;;  %s100_s6 = sshll.u32 %s1139_s28, 4  ;;  %s86_s27 = int_to_ptr.vmem [resolvable:$true] %s85_s27  ;;  %s101_s6 = int_to_ptr.vmem [resolvable:$true] %s100_s6 }
  0x14   :  { %91 = dma.hbm_to_vmem [thread:$0]  %s84_s21, 8192, %s86_s27, [#allocation9], %s1134_s12, %s1134_s12, %s1135_s13  }
  0x15   :  { %106 = dma.hbm_to_vmem [thread:$0]  %s99_s25, 4096, %s101_s6, [#allocation12], %s1131_s22, %s1131_s22, %s1132_s23  }
  0x16   :  { %1118 = dma.done.wait [#allocation3], 256  }
  0x17   :  { %1119 = vsyncadd [#allocation3], 4294967040 }
  0x18   :  { %1120 = dma.done.wait [#allocation6], 4352  }
  0x19   :  { %1121 = vsyncadd [#allocation6], 4294962944 }
  0x1a   :  { %1122 = dma.done.wait [#allocation9], 16384  }
  0x1b   :  { %1123 = vsyncadd [#allocation9], 4294950912 }
  0x1c   :  { %1124 = dma.done.wait [#allocation12], 4096  }
  0x1d   :  { %1125 = vsyncadd [#allocation12], 4294963200  ;;  %v167_v0 = vld [vmem:[#allocation7 + $0xf0] sm:$0xff]  ;;  %v168_v1 = vld [vmem:[#allocation7 + $0xf8] sm:$0xff]  ;;  %vm221_vm0 = vcmask 130048   ;;  %s821_s4 = sshll.u32 %s1304_s10, 4  ;;  %s822_s4 = int_to_ptr.hbm [resolvable:$true] %s821_s4 }
  0x1e   :  { %v165_v2 = vld [vmem:[#allocation7 + $0xe0] sm:$0xff]  ;;  %169 = vmatpush.msra.mxu0 %v167_v0  ;;  %192 = vmatpush.msra.mxu1 %v168_v1  ;;  %v166_v3 = vld [vmem:[#allocation7 + $0xe8] sm:$0xff]  ;;  %v163_v4 = vld [vmem:[#allocation7 + $0xd0] sm:$0xff]  ;;  %s1141_s18 = smov [#allocation14]   ;;  %s834_s21 = sshll.u32 %s1305_s11, 4  ;;  %s835_s21 = int_to_ptr.hbm [resolvable:$true] %s834_s21 }
  0x1f   :  { %v164_v5 = vld [vmem:[#allocation7 + $0xd8] sm:$0xff]  ;;  %v161_v6 = vld [vmem:[#allocation7 + $0xc0] sm:$0xff]  ;;  %v162_v7 = vld [vmem:[#allocation7 + $0xc8] sm:$0xff]  ;;  %s832_s10 = sshll.u32 %s1141_s18, 4  ;;  %s833_s10 = int_to_ptr.vmem [resolvable:$true] %s832_s10 }
  0x20   :  { %170 = vmatpush.msra.mxu0 %v165_v2  ;;  %193 = vmatpush.msra.mxu1 %v166_v3  ;;  %v159_v8 = vld [vmem:[#allocation7 + $0xb0] sm:$0xff]  ;;  %v160_v9 = vld [vmem:[#allocation7 + $0xb8] sm:$0xff]  ;;  %v157_v10 = vld [vmem:[#allocation7 + $0xa0] sm:$0xff] }
  0x21   :  { %v158_v11 = vld [vmem:[#allocation7 + $0xa8] sm:$0xff]  ;;  %v155_v12 = vld [vmem:[#allocation7 + $0x90] sm:$0xff]  ;;  %v156_v13 = vld [vmem:[#allocation7 + $0x98] sm:$0xff] }
  0x22   :  { %171 = vmatpush.msra.mxu0 %v163_v4  ;;  %194 = vmatpush.msra.mxu1 %v164_v5  ;;  %v153_v14 = vld [vmem:[#allocation7 + $0x80] sm:$0xff]  ;;  %v154_v15 = vld [vmem:[#allocation7 + $0x88] sm:$0xff]  ;;  %v151_v16 = vld [vmem:[#allocation7 + $0x70] sm:$0xff] }
  0x23   :  { %v152_v17 = vld [vmem:[#allocation7 + $0x78] sm:$0xff]  ;;  %v149_v18 = vld [vmem:[#allocation7 + $0x60] sm:$0xff]  ;;  %v150_v19 = vld [vmem:[#allocation7 + $0x68] sm:$0xff] }
  0x24   :  { %172 = vmatpush.msra.mxu0 %v161_v6  ;;  %195 = vmatpush.msra.mxu1 %v162_v7  ;;  %v147_v20 = vld [vmem:[#allocation7 + $0x50] sm:$0xff]  ;;  %v148_v21 = vld [vmem:[#allocation7 + $0x58] sm:$0xff]  ;;  %v145_v22 = vld [vmem:[#allocation7 + $0x40] sm:$0xff] }
  0x25   :  { %v146_v23 = vld [vmem:[#allocation7 + $0x48] sm:$0xff]  ;;  %v143_v24 = vld [vmem:[#allocation7 + $0x30] sm:$0xff]  ;;  %v144_v25 = vld [vmem:[#allocation7 + $0x38] sm:$0xff] }
  0x26   :  { %173 = vmatpush.msra.mxu0 %v159_v8  ;;  %196 = vmatpush.msra.mxu1 %v160_v9  ;;  %v141_v26 = vld [vmem:[#allocation7 + $0x20] sm:$0xff]  ;;  %v142_v27 = vld [vmem:[#allocation7 + $0x28] sm:$0xff]  ;;  %v139_v28 = vld [vmem:[#allocation7 + $0x10] sm:$0xff] }
  0x27   :  { %v140_v29 = vld [vmem:[#allocation7 + $0x18] sm:$0xff]  ;;  %v137_v30 = vld [vmem:[#allocation7] sm:$0xff]  ;;  %v138_v31 = vld [vmem:[#allocation7 + $0x8] sm:$0xff] }
  0x28   :  { %174 = vmatpush.msra.mxu0 %v157_v10  ;;  %197 = vmatpush.msra.mxu1 %v158_v11  ;;  %v135_v32 = vld [vmem:[#allocation5] sm:$0xff]  ;;  %v136_v33 = vld [vmem:[#allocation5 + $0x8] sm:$0xff]  ;;  %v307_v36 = vld [vmem:[#allocation8 + $0xe8] sm:$0xff] }
  0x29   :  { %v309_v34 = vld [vmem:[#allocation8 + $0xf8] sm:$0xff]  ;;  %v339_v37 = vld [vmem:[#allocation8 + $0x1e8] sm:$0xff]  ;;  %v1238_v60 = vld [vmem:[#allocation2] sm:$0xff] }
  0x2a   :  { %175 = vmatpush.msra.mxu0 %v155_v12  ;;  %198 = vmatpush.msra.mxu1 %v156_v13  ;;  %v341_v35 = vld [vmem:[#allocation8 + $0x1f8] sm:$0xff]  ;;  %v303_v40 = vld [vmem:[#allocation8 + $0xc8] sm:$0xff]  ;;  %v308_v61 = vld [vmem:[#allocation8 + $0xf0] sm:$0xff] }
  0x2b   :  { %v305_v38 = vld [vmem:[#allocation8 + $0xd8] sm:$0xff]  ;;  %v335_v41 = vld [vmem:[#allocation8 + $0x1c8] sm:$0xff]  ;;  %v340_v62 = vld [vmem:[#allocation8 + $0x1f0] sm:$0xff] }
  0x2c   :  { %176 = vmatpush.msra.mxu0 %v153_v14  ;;  %199 = vmatpush.msra.mxu1 %v154_v15  ;;  %v337_v39 = vld [vmem:[#allocation8 + $0x1d8] sm:$0xff]  ;;  %v299_v44 = vld [vmem:[#allocation8 + $0xa8] sm:$0xff]  ;;  %v306_v63 = vld [vmem:[#allocation8 + $0xe0] sm:$0xff] }
  0x2d   :  { %v301_v42 = vld [vmem:[#allocation8 + $0xb8] sm:$0xff]  ;;  %v331_v45 = vld [vmem:[#allocation8 + $0x1a8] sm:$0xff]  ;;  %v338_v0 = vld [vmem:[#allocation8 + $0x1e0] sm:$0xff] }
  0x2e   :  { %177 = vmatpush.msra.mxu0 %v151_v16  ;;  %200 = vmatpush.msra.mxu1 %v152_v17  ;;  %v333_v43 = vld [vmem:[#allocation8 + $0x1b8] sm:$0xff]  ;;  %v295_v50 = vld [vmem:[#allocation8 + $0x88] sm:$0xff]  ;;  %v304_v1 = vld [vmem:[#allocation8 + $0xd0] sm:$0xff] }
  0x2f   :  { %v297_v46 = vld [vmem:[#allocation8 + $0x98] sm:$0xff]  ;;  %v327_v51 = vld [vmem:[#allocation8 + $0x188] sm:$0xff]  ;;  %v336_v2 = vld [vmem:[#allocation8 + $0x1d0] sm:$0xff] }
  0x30   :  { %178 = vmatpush.msra.mxu0 %v149_v18  ;;  %201 = vmatpush.msra.mxu1 %v150_v19  ;;  %v329_v47 = vld [vmem:[#allocation8 + $0x198] sm:$0xff]  ;;  %v291_v54 = vld [vmem:[#allocation8 + $0x68] sm:$0xff]  ;;  %v302_v3 = vld [vmem:[#allocation8 + $0xc0] sm:$0xff] }
  0x31   :  { %v293_v52 = vld [vmem:[#allocation8 + $0x78] sm:$0xff]  ;;  %v323_v55 = vld [vmem:[#allocation8 + $0x168] sm:$0xff]  ;;  %v334_v4 = vld [vmem:[#allocation8 + $0x1c0] sm:$0xff] }
  0x32   :  { %179 = vmatpush.msra.mxu0 %v147_v20  ;;  %202 = vmatpush.msra.mxu1 %v148_v21  ;;  %v325_v53 = vld [vmem:[#allocation8 + $0x178] sm:$0xff]  ;;  %v1244_v5 = vld [vmem:[#allocation2 + $0x8] sm:$0xff]  ;;  %v300_v6 = vld [vmem:[#allocation8 + $0xb0] sm:$0xff] }
  0x33   :  { %v289_v56 = vld [vmem:[#allocation8 + $0x58] sm:$0xff]  ;;  %v332_v7 = vld [vmem:[#allocation8 + $0x1b0] sm:$0xff]  ;;  %v298_v8 = vld [vmem:[#allocation8 + $0xa0] sm:$0xff] }
  0x34   :  { %180 = vmatpush.msra.mxu0 %v145_v22  ;;  %203 = vmatpush.msra.mxu1 %v146_v23  ;;  %v321_v57 = vld [vmem:[#allocation8 + $0x158] sm:$0xff]  ;;  %v330_v9 = vld [vmem:[#allocation8 + $0x1a0] sm:$0xff]  ;;  %v296_v10 = vld [vmem:[#allocation8 + $0x90] sm:$0xff] }
  0x35   :  { %v328_v11 = vld [vmem:[#allocation8 + $0x190] sm:$0xff]  ;;  %v294_v12 = vld [vmem:[#allocation8 + $0x80] sm:$0xff]  ;;  %v287_v22 = vld [vmem:[#allocation8 + $0x48] sm:$0xff] }
  0x36   :  { %181 = vmatpush.msra.mxu0 %v143_v24  ;;  %204 = vmatpush.msra.mxu1 %v144_v25  ;;  %v326_v13 = vld [vmem:[#allocation8 + $0x180] sm:$0xff]  ;;  %v292_v14 = vld [vmem:[#allocation8 + $0x70] sm:$0xff]  ;;  %v319_v23 = vld [vmem:[#allocation8 + $0x148] sm:$0xff] }
  0x37   :  { %v324_v15 = vld [vmem:[#allocation8 + $0x170] sm:$0xff]  ;;  %v290_v16 = vld [vmem:[#allocation8 + $0x60] sm:$0xff] }
  0x38   :  { %182 = vmatpush.msra.mxu0 %v141_v26  ;;  %205 = vmatpush.msra.mxu1 %v142_v27  ;;  %v322_v17 = vld [vmem:[#allocation8 + $0x160] sm:$0xff]  ;;  %v288_v18 = vld [vmem:[#allocation8 + $0x50] sm:$0xff]  ;;  %v285_v26 = vld [vmem:[#allocation8 + $0x38] sm:$0xff] }
  0x39   :  { %v320_v19 = vld [vmem:[#allocation8 + $0x150] sm:$0xff]  ;;  %v286_v20 = vld [vmem:[#allocation8 + $0x40] sm:$0xff]  ;;  %v317_v27 = vld [vmem:[#allocation8 + $0x138] sm:$0xff] }
  0x3a   :  { %183 = vmatpush.msra.mxu0 %v139_v28  ;;  %206 = vmatpush.msra.mxu1 %v140_v29  ;;  %v318_v21 = vld [vmem:[#allocation8 + $0x140] sm:$0xff]  ;;  %v284_v24 = vld [vmem:[#allocation8 + $0x30] sm:$0xff] }
  0x3b   :  { %v316_v25 = vld [vmem:[#allocation8 + $0x130] sm:$0xff]  ;;  %v282_v28 = vld [vmem:[#allocation8 + $0x20] sm:$0xff] }
  0x3c   :  { %184 = vmatpush.msra.mxu0 %v137_v30  ;;  %207 = vmatpush.msra.mxu1 %v138_v31  ;;  %v314_v29 = vld [vmem:[#allocation8 + $0x120] sm:$0xff]  ;;  %v283_v30 = vld [vmem:[#allocation8 + $0x28] sm:$0xff] }
  0x3d   :  { %185 = vmatmul.f32.vlgmr.msra.gmra.mxu0 %v135_v32  ;;  %208 = vmatmul.f32.vlgmr.msra.gmra.mxu1 %v135_v32  ;;  %v315_v31 = vld [vmem:[#allocation8 + $0x128] sm:$0xff]  ;;  %v280_v32 = vld [vmem:[#allocation8 + $0x10] sm:$0xff] }
  0x3e   :  { %388 = vmatpush.msrb.mxu0 %v309_v34  ;;  %411 = vmatpush.msrb.mxu1 %v341_v35  ;;  %v281_v34 = vld [vmem:[#allocation8 + $0x18] sm:$0xff] }
  0x3f   :  { %v313_v35 = vld [vmem:[#allocation8 + $0x118] sm:$0xff] }
  0x40   :  { %389 = vmatpush.msrb.mxu0 %v307_v36  ;;  %412 = vmatpush.msrb.mxu1 %v339_v37  ;;  %v278_v36 = vld [vmem:[#allocation8] sm:$0xff] }
  0x41   :  { %v310_v37 = vld [vmem:[#allocation8 + $0x100] sm:$0xff] }
  0x42   :  { %390 = vmatpush.msrb.mxu0 %v305_v38  ;;  %413 = vmatpush.msrb.mxu1 %v337_v39  ;;  %v279_v38 = vld [vmem:[#allocation8 + $0x8] sm:$0xff] }
  0x43   :  { %v311_v39 = vld [vmem:[#allocation8 + $0x108] sm:$0xff] }
  0x44   :  { %391 = vmatpush.msrb.mxu0 %v303_v40  ;;  %414 = vmatpush.msrb.mxu1 %v335_v41  ;;  %v215_v40 = vld [vmem:[%s1297_s3] sm:$0x3] }
  0x45   :  { %188 = vmatmul.f32.gmra.mxu0 %v136_v33  ;;  %211 = vmatmul.f32.gmra.mxu1 %v136_v33  ;;  %v312_v33 = vld [vmem:[#allocation8 + $0x110] sm:$0xff]  ;;  %v217_v41 = vperm.slane %v215_v40, 0 }
  0x46   :  { %392 = vmatpush.msrb.mxu0 %v301_v42  ;;  %415 = vmatpush.msrb.mxu1 %v333_v43  ;;  %v218_v42 = vperm.slane %v215_v40, 1  ;;  %v510_v40 = vld [vmem:[#allocation10 + $0xa0] sm:$0xff] }
  0x48   :  { %393 = vmatpush.msrb.mxu0 %v299_v44  ;;  %416 = vmatpush.msrb.mxu1 %v331_v45 }
  0x4a   :  { %394 = vmatpush.msrb.mxu0 %v297_v46  ;;  %417 = vmatpush.msrb.mxu1 %v329_v47 }
  0x4c   :  { %395 = vmatpush.msrb.mxu0 %v295_v50  ;;  %418 = vmatpush.msrb.mxu1 %v327_v51 }
  0x4e   :  { %396 = vmatpush.msrb.mxu0 %v293_v52  ;;  %419 = vmatpush.msrb.mxu1 %v325_v53 }
  0x50   :  { %397 = vmatpush.msrb.mxu0 %v291_v54  ;;  %420 = vmatpush.msrb.mxu1 %v323_v55  ;;  %v521_v55 = vld [vmem:[#allocation10 + $0xf8] sm:$0xff] }
  0x52   :  { %398 = vmatpush.msrb.mxu0 %v289_v56  ;;  %421 = vmatpush.msrb.mxu1 %v321_v57  ;;  %v553_v56 = vld [vmem:[#allocation10 + $0x1f8] sm:$0xff]  ;;  %v519_v57 = vld [vmem:[#allocation10 + $0xe8] sm:$0xff] }
  0x54   :  { %399 = vmatpush.msrb.mxu0 %v287_v22  ;;  %422 = vmatpush.msrb.mxu1 %v319_v23  ;;  %v535_v22 = vld [vmem:[#allocation10 + $0x168] sm:$0xff] }
  0x56   :  { %400 = vmatpush.msrb.mxu0 %v285_v26  ;;  %423 = vmatpush.msrb.mxu1 %v317_v27  ;;  %v501_v26 = vld [vmem:[#allocation10 + $0x58] sm:$0xff] }
  0x57   :  { %v533_v27 = vld [vmem:[#allocation10 + $0x158] sm:$0xff] }
  0x58   :  { %401 = vmatpush.msrb.mxu0 %v283_v30  ;;  %424 = vmatpush.msrb.mxu1 %v315_v31  ;;  %v520_v30 = vld [vmem:[#allocation10 + $0xf0] sm:$0xff]  ;;  %v546_v31 = vld [vmem:[#allocation10 + $0x1c0] sm:$0xff] }
  0x5a   :  { %402 = vmatpush.msrb.mxu0 %v281_v34  ;;  %425 = vmatpush.msrb.mxu1 %v313_v35  ;;  %v516_v34 = vld [vmem:[#allocation10 + $0xd0] sm:$0xff]  ;;  %v542_v35 = vld [vmem:[#allocation10 + $0x1a0] sm:$0xff] }
  0x5c   :  { %403 = vmatpush.msrb.mxu0 %v279_v38  ;;  %426 = vmatpush.msrb.mxu1 %v311_v39  ;;  %v512_v38 = vld [vmem:[#allocation10 + $0xb0] sm:$0xff]  ;;  %v538_v39 = vld [vmem:[#allocation10 + $0x180] sm:$0xff] }
  0x5e   :  { %600 = vmatpush.msra.mxu0 %v521_v55  ;;  %623 = vmatpush.msra.mxu1 %v553_v56  ;;  %v497_v55 = vld [vmem:[#allocation10 + $0x38] sm:$0xff] }
  0x5f   :  { %v529_v56 = vld [vmem:[#allocation10 + $0x138] sm:$0xff] }
  0x60   :  { %601 = vmatpush.msra.mxu0 %v519_v57  ;;  %v494_v57 = vld [vmem:[#allocation10 + $0x20] sm:$0xff] }
  0xba   :  { %v186_v48 = vpop.f32.mrf.mxu0  ;;  %v209_v49 = vpop.f32.mrf.mxu1 }
  0xc2   :  { %v189_v58 = vpop.f32.mrf.mxu0  ;;  %v212_v59 = vpop.f32.mrf.mxu1 }
  0xc3   :  { %242 = vmatpush.msra.mxu2 %v189_v58  ;;  %265 = vmatpush.msra.mxu3 %v212_v59  ;;  %v551_v58 = vld [vmem:[#allocation10 + $0x1e8] sm:$0xff] }
  0xc4   :  { %624 = vmatpush.msra.mxu1 %v551_v58  ;;  %v526_v58 = vld [vmem:[#allocation10 + $0x120] sm:$0xff] }
  0xc5   :  { %243 = vmatpush.msra.mxu2 %v186_v48  ;;  %266 = vmatpush.msra.mxu3 %v209_v49 }
  0xc6   :  { %855 = vmatmul.msk.f32.vlgmr.msra.gmra.mxu2 %vm221_vm0, %v1238_v60  ;;  %857 = vmatmul.msk.f32.vlgmr.msra.gmra.mxu3 %vm221_vm0, %v1238_v60 }
  0xc7   :  { %342 = vmatpush.msrb.mxu2 %v308_v61  ;;  %365 = vmatpush.msrb.mxu3 %v340_v62  ;;  %v517_v61 = vld [vmem:[#allocation10 + $0xd8] sm:$0xff] }
  0xc8   :  { %v549_v62 = vld [vmem:[#allocation10 + $0x1d8] sm:$0xff]  ;;  %602 = vmatpush.msra.mxu0 %v517_v61  ;;  %v527_v61 = vld [vmem:[#allocation10 + $0x128] sm:$0xff] }
  0xc9   :  { %343 = vmatpush.msrb.mxu2 %v306_v63  ;;  %366 = vmatpush.msrb.mxu3 %v338_v0  ;;  %v515_v0 = vld [vmem:[#allocation10 + $0xc8] sm:$0xff] }
  0xca   :  { %625 = vmatpush.msra.mxu1 %v549_v62  ;;  %603 = vmatpush.msra.mxu0 %v515_v0  ;;  %v492_v62 = vld [vmem:[#allocation10 + $0x10] sm:$0xff]  ;;  %v493_v0 = vld [vmem:[#allocation10 + $0x18] sm:$0xff] }
  0xcb   :  { %344 = vmatpush.msrb.mxu2 %v304_v1  ;;  %367 = vmatpush.msrb.mxu3 %v336_v2  ;;  %v547_v1 = vld [vmem:[#allocation10 + $0x1c8] sm:$0xff]  ;;  %v513_v2 = vld [vmem:[#allocation10 + $0xb8] sm:$0xff] }
  0xcc   :  { %626 = vmatpush.msra.mxu1 %v547_v1  ;;  %604 = vmatpush.msra.mxu0 %v513_v2  ;;  %v525_v1 = vld [vmem:[#allocation10 + $0x118] sm:$0xff]  ;;  %v490_v2 = vld [vmem:[#allocation10] sm:$0xff] }
  0xcd   :  { %345 = vmatpush.msrb.mxu2 %v302_v3  ;;  %368 = vmatpush.msrb.mxu3 %v334_v4  ;;  %v545_v3 = vld [vmem:[#allocation10 + $0x1b8] sm:$0xff]  ;;  %v511_v4 = vld [vmem:[#allocation10 + $0xa8] sm:$0xff] }
  0xce   :  { %856 = vmatmul.msk.f32.gmra.mxu2 %vm221_vm0, %v1244_v5  ;;  %858 = vmatmul.msk.f32.gmra.mxu3 %vm221_vm0, %v1244_v5 }
  0xcf   :  { %346 = vmatpush.msrb.mxu2 %v300_v6  ;;  %369 = vmatpush.msrb.mxu3 %v332_v7  ;;  %v543_v7 = vld [vmem:[#allocation10 + $0x1a8] sm:$0xff] }
  0xd0   :  { %627 = vmatpush.msra.mxu1 %v545_v3  ;;  %605 = vmatpush.msra.mxu0 %v511_v4  ;;  %v522_v3 = vld [vmem:[#allocation10 + $0x100] sm:$0xff]  ;;  %v491_v4 = vld [vmem:[#allocation10 + $0x8] sm:$0xff] }
  0xd1   :  { %347 = vmatpush.msrb.mxu2 %v298_v8  ;;  %370 = vmatpush.msrb.mxu3 %v330_v9  ;;  %v509_v9 = vld [vmem:[#allocation10 + $0x98] sm:$0xff] }
  0xd2   :  { %628 = vmatpush.msra.mxu1 %v543_v7  ;;  %606 = vmatpush.msra.mxu0 %v509_v9  ;;  %v434_v7 = vld [vmem:[%s1299_s5] sm:$0x3] }
  0xd3   :  { %348 = vmatpush.msrb.mxu2 %v296_v10  ;;  %371 = vmatpush.msrb.mxu3 %v328_v11  ;;  %v541_v11 = vld [vmem:[#allocation10 + $0x198] sm:$0xff] }
  0xd4   :  { %629 = vmatpush.msra.mxu1 %v541_v11  ;;  %v436_v11 = vperm.slane %v434_v7, 0 }
  0xd5   :  { %349 = vmatpush.msrb.mxu2 %v294_v12  ;;  %372 = vmatpush.msrb.mxu3 %v326_v13  ;;  %v507_v13 = vld [vmem:[#allocation10 + $0x88] sm:$0xff] }
  0xd6   :  { %607 = vmatpush.msra.mxu0 %v507_v13 }
  0xd7   :  { %350 = vmatpush.msrb.mxu2 %v292_v14  ;;  %373 = vmatpush.msrb.mxu3 %v324_v15  ;;  %v539_v15 = vld [vmem:[#allocation10 + $0x188] sm:$0xff] }
  0xd8   :  { %630 = vmatpush.msra.mxu1 %v539_v15 }
  0xd9   :  { %351 = vmatpush.msrb.mxu2 %v290_v16  ;;  %374 = vmatpush.msrb.mxu3 %v322_v17  ;;  %v505_v16 = vld [vmem:[#allocation10 + $0x78] sm:$0xff] }
  0xda   :  { %608 = vmatpush.msra.mxu0 %v505_v16 }
  0xdb   :  { %352 = vmatpush.msrb.mxu2 %v288_v18  ;;  %375 = vmatpush.msrb.mxu3 %v320_v19  ;;  %v537_v18 = vld [vmem:[#allocation10 + $0x178] sm:$0xff]  ;;  %v552_v19 = vld [vmem:[#allocation10 + $0x1f0] sm:$0xff] }
  0xdc   :  { %631 = vmatpush.msra.mxu1 %v537_v18 }
  0xdd   :  { %353 = vmatpush.msrb.mxu2 %v286_v20  ;;  %376 = vmatpush.msrb.mxu3 %v318_v21  ;;  %v503_v20 = vld [vmem:[#allocation10 + $0x68] sm:$0xff] }
  0xde   :  { %609 = vmatpush.msra.mxu0 %v503_v20  ;;  %632 = vmatpush.msra.mxu1 %v535_v22 }
  0xdf   :  { %354 = vmatpush.msrb.mxu2 %v284_v24  ;;  %377 = vmatpush.msrb.mxu3 %v316_v25  ;;  %v550_v24 = vld [vmem:[#allocation10 + $0x1e0] sm:$0xff] }
  0xe0   :  { %610 = vmatpush.msra.mxu0 %v501_v26  ;;  %633 = vmatpush.msra.mxu1 %v533_v27  ;;  %v736_v26 = vld [vmem:[#allocation11 + $0xf0] sm:$0xff]  ;;  %v719_v27 = vld [vmem:[#allocation11 + $0x68] sm:$0xff] }
  0xe1   :  { %355 = vmatpush.msrb.mxu2 %v282_v28  ;;  %378 = vmatpush.msrb.mxu3 %v314_v29  ;;  %v548_v28 = vld [vmem:[#allocation10 + $0x1d0] sm:$0xff] }
  0xe3   :  { %356 = vmatpush.msrb.mxu2 %v280_v32  ;;  %379 = vmatpush.msrb.mxu3 %v312_v33  ;;  %v518_v32 = vld [vmem:[#allocation10 + $0xe0] sm:$0xff]  ;;  %v544_v33 = vld [vmem:[#allocation10 + $0x1b0] sm:$0xff] }
  0xe5   :  { %357 = vmatpush.msrb.mxu2 %v278_v36  ;;  %380 = vmatpush.msrb.mxu3 %v310_v37  ;;  %v514_v36 = vld [vmem:[#allocation10 + $0xc0] sm:$0xff]  ;;  %v540_v37 = vld [vmem:[#allocation10 + $0x190] sm:$0xff] }
 0x149   :  { %v245_v43 = vpop.f32.mrf.mxu2  ;;  %v268_v44 = vpop.f32.mrf.mxu3 }
 0x14a   :  { %v246_v45 = vadd.f32 %v245_v43, %v217_v41  ;;  %v269_v46 = vadd.f32 %v268_v44, %v218_v42  ;;  %v534_v43 = vld [vmem:[#allocation10 + $0x160] sm:$0xff] }
 0x14b   :  { %v506_v44 = vld [vmem:[#allocation10 + $0x80] sm:$0xff] }
 0x14c   :  { %898 = vtanh.f32 %v246_v45  ;;  %v532_v45 = vld [vmem:[#allocation10 + $0x150] sm:$0xff] }
 0x14d   :  { %900 = vtanh.f32 %v269_v46  ;;  %v504_v46 = vld [vmem:[#allocation10 + $0x70] sm:$0xff] }
 0x151   :  { %v248_v47 = vpop.f32.mrf.mxu2  ;;  %v271_v48 = vpop.f32.mrf.mxu3 }
 0x152   :  { %v899_v49 = vpop.eup %898  ;;  %v249_v50 = vadd.f32 %v248_v47, %v217_v41  ;;  %v272_v51 = vadd.f32 %v271_v48, %v218_v42  ;;  %v536_v41 = vld [vmem:[#allocation10 + $0x170] sm:$0xff]  ;;  %v502_v47 = vld [vmem:[#allocation10 + $0x60] sm:$0xff] }
 0x153   :  { %v901_v52 = vpop.eup %900  ;;  %358 = vmatmul.f32.vlgmr.msrb.gmra.mxu2 %v899_v49  ;;  %404 = vmatmul.f32.vlgmr.msrb.gmra.mxu0 %v899_v49  ;;  %v508_v42 = vld [vmem:[#allocation10 + $0x90] sm:$0xff]  ;;  %v498_v49 = vld [vmem:[#allocation10 + $0x40] sm:$0xff] }
 0x154   :  { %902 = vtanh.f32 %v249_v50  ;;  %381 = vmatmul.f32.vlgmr.msrb.gmra.mxu3 %v901_v52  ;;  %427 = vmatmul.f32.vlgmr.msrb.gmra.mxu1 %v901_v52  ;;  %v500_v48 = vld [vmem:[#allocation10 + $0x50] sm:$0xff]  ;;  %v530_v50 = vld [vmem:[#allocation10 + $0x140] sm:$0xff]  ;;  %v531_v52 = vld [vmem:[#allocation10 + $0x148] sm:$0xff] }
 0x155   :  { %904 = vtanh.f32 %v272_v51  ;;  %v499_v51 = vld [vmem:[#allocation10 + $0x48] sm:$0xff]  ;;  %634 = vmatpush.msra.mxu1 %v531_v52 }
 0x156   :  { %611 = vmatpush.msra.mxu0 %v499_v51 }
 0x157   :  { %635 = vmatpush.msra.mxu1 %v529_v56  ;;  %v710_v56 = vld [vmem:[#allocation11 + $0x20] sm:$0xff] }
 0x158   :  { %612 = vmatpush.msra.mxu0 %v497_v55 }
 0x159   :  { %636 = vmatpush.msra.mxu1 %v527_v61  ;;  %v708_v61 = vld [vmem:[#allocation11 + $0x10] sm:$0xff] }
 0x15a   :  { %v903_v53 = vpop.eup %902 }
 0x15b   :  { %v905_v54 = vpop.eup %904  ;;  %361 = vmatmul.f32.gmra.mxu2 %v903_v53  ;;  %407 = vmatmul.f32.gmra.mxu0 %v903_v53  ;;  %v496_v53 = vld [vmem:[#allocation10 + $0x30] sm:$0xff] }
 0x15c   :  { %384 = vmatmul.f32.gmra.mxu3 %v905_v54  ;;  %430 = vmatmul.f32.gmra.mxu1 %v905_v54  ;;  %v528_v54 = vld [vmem:[#allocation10 + $0x130] sm:$0xff] }
 0x15d   :  { %637 = vmatpush.msra.mxu1 %v525_v1  ;;  %v706_v1 = vld [vmem:[#allocation11] sm:$0xff] }
 0x1d0   :  { %v405_v59 = vpop.f32.mrf.mxu0 }
 0x1d1   :  { %v428_v63 = vpop.f32.mrf.mxu1 }
 0x1d2   :  { %v429_v17 = vadd.f32 %v428_v63, %v405_v59  ;;  %v495_v59 = vld [vmem:[#allocation10 + $0x28] sm:$0xff]  ;;  %v524_v63 = vld [vmem:[#allocation10 + $0x110] sm:$0xff] }
 0x1d3   :  { %613 = vmatpush.msra.mxu0 %v495_v59  ;;  %v725_v59 = vld [vmem:[#allocation11 + $0x98] sm:$0xff] }
 0x1d5   :  { %614 = vmatpush.msra.mxu0 %v493_v0  ;;  %v723_v0 = vld [vmem:[#allocation11 + $0x88] sm:$0xff] }
 0x1d6   :  { %v359_v6 = vpop.f32.mrf.mxu2 }
 0x1d7   :  { %v382_v8 = vpop.f32.mrf.mxu3  ;;  %615 = vmatpush.msra.mxu0 %v491_v4 }
 0x1d8   :  { %v408_v10 = vpop.f32.mrf.mxu0  ;;  %v383_v29 = vadd.f32 %v382_v8, %v359_v6  ;;  %v523_v6 = vld [vmem:[#allocation10 + $0x108] sm:$0xff]  ;;  %v437_v8 = vperm.slane %v434_v7, 1 }
 0x1d9   :  { %v431_v12 = vpop.f32.mrf.mxu1  ;;  %638 = vmatpush.msra.mxu1 %v523_v6 }
 0x1da   :  { %v432_v14 = vadd.f32 %v431_v12, %v408_v10 }
 0x1dc   :  { %477 = vmatpush.msra.mxu3 %v432_v14 }
 0x1de   :  { %478 = vmatpush.msra.mxu3 %v429_v17  ;;  %v362_v21 = vpop.f32.mrf.mxu2 }
 0x1df   :  { %v385_v23 = vpop.f32.mrf.mxu3  ;;  %861 = vmatmul.msk.f32.vlgmr.msra.gmra.mxu3 %vm221_vm0, %v1238_v60 }
 0x1e0   :  { %v386_v25 = vadd.f32 %v385_v23, %v362_v21  ;;  %577 = vmatpush.msrb.mxu3 %v552_v19  ;;  %v721_v23 = vld [vmem:[#allocation11 + $0x78] sm:$0xff] }
 0x1e1   :  { %738 = vmatpush.msrb.mxu0 %v721_v23 }
 0x1e2   :  { %454 = vmatpush.msra.mxu2 %v386_v25  ;;  %578 = vmatpush.msrb.mxu3 %v550_v24  ;;  %v737_v24 = vld [vmem:[#allocation11 + $0xf8] sm:$0xff]  ;;  %v720_v25 = vld [vmem:[#allocation11 + $0x70] sm:$0xff] }
 0x1e3   :  { %761 = vmatpush.msrb.mxu1 %v737_v24  ;;  %739 = vmatpush.msrb.mxu0 %v720_v25 }
 0x1e4   :  { %455 = vmatpush.msra.mxu2 %v383_v29  ;;  %579 = vmatpush.msrb.mxu3 %v548_v28  ;;  %v735_v28 = vld [vmem:[#allocation11 + $0xe8] sm:$0xff] }
 0x1e5   :  { %859 = vmatmul.msk.f32.vlgmr.msra.gmra.mxu2 %vm221_vm0, %v1238_v60  ;;  %762 = vmatpush.msrb.mxu1 %v736_v26 }
 0x1e6   :  { %554 = vmatpush.msrb.mxu2 %v520_v30  ;;  %580 = vmatpush.msrb.mxu3 %v546_v31  ;;  %v718_v30 = vld [vmem:[#allocation11 + $0x60] sm:$0xff] }
 0x1e7   :  { %862 = vmatmul.msk.f32.gmra.mxu3 %vm221_vm0, %v1244_v5  ;;  %v734_v31 = vld [vmem:[#allocation11 + $0xe0] sm:$0xff]  ;;  %740 = vmatpush.msrb.mxu0 %v719_v27 }
 0x1e8   :  { %555 = vmatpush.msrb.mxu2 %v518_v32  ;;  %581 = vmatpush.msrb.mxu3 %v544_v33  ;;  %v717_v33 = vld [vmem:[#allocation11 + $0x58] sm:$0xff] }
 0x1e9   :  { %763 = vmatpush.msrb.mxu1 %v735_v28  ;;  %741 = vmatpush.msrb.mxu0 %v718_v30 }
 0x1ea   :  { %556 = vmatpush.msrb.mxu2 %v516_v34  ;;  %582 = vmatpush.msrb.mxu3 %v542_v35  ;;  %v733_v34 = vld [vmem:[#allocation11 + $0xd8] sm:$0xff]  ;;  %v716_v35 = vld [vmem:[#allocation11 + $0x50] sm:$0xff] }
 0x1eb   :  { %764 = vmatpush.msrb.mxu1 %v734_v31  ;;  %742 = vmatpush.msrb.mxu0 %v717_v33 }
 0x1ec   :  { %557 = vmatpush.msrb.mxu2 %v514_v36  ;;  %583 = vmatpush.msrb.mxu3 %v540_v37  ;;  %v732_v36 = vld [vmem:[#allocation11 + $0xd0] sm:$0xff] }
 0x1ed   :  { %860 = vmatmul.msk.f32.gmra.mxu2 %vm221_vm0, %v1244_v5  ;;  %765 = vmatpush.msrb.mxu1 %v733_v34 }
 0x1ee   :  { %558 = vmatpush.msrb.mxu2 %v512_v38  ;;  %584 = vmatpush.msrb.mxu3 %v538_v39  ;;  %v715_v39 = vld [vmem:[#allocation11 + $0x48] sm:$0xff] }
 0x1ef   :  { %743 = vmatpush.msrb.mxu0 %v716_v35  ;;  %766 = vmatpush.msrb.mxu1 %v732_v36 }
 0x1f0   :  { %559 = vmatpush.msrb.mxu2 %v510_v40  ;;  %585 = vmatpush.msrb.mxu3 %v536_v41  ;;  %v731_v40 = vld [vmem:[#allocation11 + $0xc8] sm:$0xff] }
 0x1f1   :  { %744 = vmatpush.msrb.mxu0 %v715_v39  ;;  %767 = vmatpush.msrb.mxu1 %v731_v40 }
 0x1f2   :  { %560 = vmatpush.msrb.mxu2 %v508_v42  ;;  %586 = vmatpush.msrb.mxu3 %v534_v43  ;;  %v714_v42 = vld [vmem:[#allocation11 + $0x40] sm:$0xff] }
 0x1f3   :  { %745 = vmatpush.msrb.mxu0 %v714_v42 }
 0x1f4   :  { %561 = vmatpush.msrb.mxu2 %v506_v44  ;;  %587 = vmatpush.msrb.mxu3 %v532_v45  ;;  %v730_v44 = vld [vmem:[#allocation11 + $0xc0] sm:$0xff]  ;;  %v713_v45 = vld [vmem:[#allocation11 + $0x38] sm:$0xff] }
 0x1f5   :  { %768 = vmatpush.msrb.mxu1 %v730_v44  ;;  %746 = vmatpush.msrb.mxu0 %v713_v45 }
 0x1f6   :  { %562 = vmatpush.msrb.mxu2 %v504_v46  ;;  %588 = vmatpush.msrb.mxu3 %v530_v50  ;;  %v728_v50 = vld [vmem:[#allocation11 + $0xb0] sm:$0xff] }
 0x1f8   :  { %563 = vmatpush.msrb.mxu2 %v502_v47  ;;  %589 = vmatpush.msrb.mxu3 %v528_v54  ;;  %v729_v47 = vld [vmem:[#allocation11 + $0xb8] sm:$0xff]  ;;  %v727_v54 = vld [vmem:[#allocation11 + $0xa8] sm:$0xff] }
 0x1f9   :  { %769 = vmatpush.msrb.mxu1 %v729_v47 }
 0x1fa   :  { %564 = vmatpush.msrb.mxu2 %v500_v48  ;;  %590 = vmatpush.msrb.mxu3 %v526_v58  ;;  %v709_v58 = vld [vmem:[#allocation11 + $0x18] sm:$0xff] }
 0x1fb   :  { %770 = vmatpush.msrb.mxu1 %v728_v50 }
 0x1fc   :  { %565 = vmatpush.msrb.mxu2 %v498_v49  ;;  %591 = vmatpush.msrb.mxu3 %v524_v63  ;;  %v712_v49 = vld [vmem:[#allocation11 + $0x30] sm:$0xff]  ;;  %v707_v63 = vld [vmem:[#allocation11 + $0x8] sm:$0xff] }
 0x1fd   :  { %747 = vmatpush.msrb.mxu0 %v712_v49  ;;  %771 = vmatpush.msrb.mxu1 %v727_v54 }
 0x1fe   :  { %566 = vmatpush.msrb.mxu2 %v496_v53  ;;  %592 = vmatpush.msrb.mxu3 %v522_v3  ;;  %v711_v53 = vld [vmem:[#allocation11 + $0x28] sm:$0xff]  ;;  %v646_v3 = vld [vmem:[%s1301_s7] sm:$0x3]  ;;  %s1140_s7 = smov [#allocation13]  }
 0x1ff   :  { %748 = vmatpush.msrb.mxu0 %v711_v53  ;;  %v649_v4 = vperm.slane %v646_v3, 1  ;;  %s819_s14 = sshll.u32 %s1140_s7, 4  ;;  %s820_s14 = int_to_ptr.vmem [resolvable:$true] %s819_s14 }
 0x200   :  { %567 = vmatpush.msrb.mxu2 %v494_v57  ;;  %v726_v57 = vld [vmem:[#allocation11 + $0xa0] sm:$0xff] }
 0x201   :  { %749 = vmatpush.msrb.mxu0 %v710_v56  ;;  %772 = vmatpush.msrb.mxu1 %v726_v57 }
 0x202   :  { %568 = vmatpush.msrb.mxu2 %v492_v62  ;;  %v724_v62 = vld [vmem:[#allocation11 + $0x90] sm:$0xff] }
 0x203   :  { %750 = vmatpush.msrb.mxu0 %v709_v58  ;;  %773 = vmatpush.msrb.mxu1 %v725_v59 }
 0x204   :  { %569 = vmatpush.msrb.mxu2 %v490_v2  ;;  %v722_v2 = vld [vmem:[#allocation11 + $0x80] sm:$0xff] }
 0x205   :  { %751 = vmatpush.msrb.mxu0 %v708_v61  ;;  %774 = vmatpush.msrb.mxu1 %v724_v62 }
 0x207   :  { %752 = vmatpush.msrb.mxu0 %v707_v63  ;;  %775 = vmatpush.msrb.mxu1 %v723_v0 }
 0x209   :  { %753 = vmatpush.msrb.mxu0 %v706_v1  ;;  %776 = vmatpush.msrb.mxu1 %v722_v2 }
 0x262   :  { %v480_v9 = vpop.f32.mrf.mxu3 }
 0x263   :  { %v481_v10 = vadd.f32 %v480_v9, %v437_v8 }
 0x265   :  { %906 = vtanh.f32 %v481_v10 }
 0x268   :  { %v457_v12 = vpop.f32.mrf.mxu2 }
 0x269   :  { %v458_v13 = vadd.f32 %v457_v12, %v436_v11 }
 0x26a   :  { %v483_v14 = vpop.f32.mrf.mxu3 }
 0x26b   :  { %v907_v15 = vpop.eup %906  ;;  %908 = vtanh.f32 %v458_v13  ;;  %v484_v16 = vadd.f32 %v483_v14, %v437_v8  ;;  %v648_v8 = vperm.slane %v646_v3, 0 }
 0x26c   :  { %593 = vmatmul.f32.vlgmr.msrb.gmra.mxu3 %v907_v15  ;;  %639 = vmatmul.f32.vlgmr.msra.gmra.mxu1 %v907_v15 }
 0x26d   :  { %910 = vtanh.f32 %v484_v16 }
 0x270   :  { %v460_v17 = vpop.f32.mrf.mxu2 }
 0x271   :  { %v909_v18 = vpop.eup %908  ;;  %v461_v19 = vadd.f32 %v460_v17, %v436_v11 }
 0x272   :  { %570 = vmatmul.f32.vlgmr.msrb.gmra.mxu2 %v909_v18  ;;  %616 = vmatmul.f32.vlgmr.msra.gmra.mxu0 %v909_v18 }
 0x273   :  { %v911_v20 = vpop.eup %910  ;;  %912 = vtanh.f32 %v461_v19 }
 0x274   :  { %596 = vmatmul.f32.gmra.mxu3 %v911_v20  ;;  %642 = vmatmul.f32.gmra.mxu1 %v911_v20 }
 0x279   :  { %v913_v21 = vpop.eup %912 }
 0x27a   :  { %573 = vmatmul.f32.gmra.mxu2 %v913_v21  ;;  %619 = vmatmul.f32.gmra.mxu0 %v913_v21 }
 0x2e9   :  { %v640_v22 = vpop.f32.mrf.mxu1 }
 0x2ef   :  { %v617_v29 = vpop.f32.mrf.mxu0  ;;  %v594_v32 = vpop.f32.mrf.mxu3 }
 0x2f0   :  { %v641_v46 = vadd.f32 %v640_v22, %v617_v29 }
 0x2f1   :  { %v643_v38 = vpop.f32.mrf.mxu1 }
 0x2f5   :  { %v571_v37 = vpop.f32.mrf.mxu2 }
 0x2f6   :  { %v595_v55 = vadd.f32 %v594_v32, %v571_v37 }
 0x2f7   :  { %v620_v41 = vpop.f32.mrf.mxu0  ;;  %v597_v48 = vpop.f32.mrf.mxu3 }
 0x2f8   :  { %v644_v43 = vadd.f32 %v643_v38, %v620_v41 }
 0x2fa   :  { %689 = vmatpush.msra.mxu3 %v644_v43 }
 0x2fc   :  { %690 = vmatpush.msra.mxu3 %v641_v46 }
 0x2fd   :  { %v574_v51 = vpop.f32.mrf.mxu2  ;;  %865 = vmatmul.msk.f32.vlgmr.msra.gmra.mxu3 %vm221_vm0, %v1238_v60 }
 0x2fe   :  { %v598_v52 = vadd.f32 %v597_v48, %v574_v51  ;;  %869 = vmatpush.msrb.mxu3 %v721_v23 }
 0x300   :  { %666 = vmatpush.msra.mxu2 %v598_v52  ;;  %870 = vmatpush.msrb.mxu3 %v720_v25  ;;  %v897_v25 = vld [vmem:[%s1303_s9] ss:$0 sm:$0xff] }
 0x302   :  { %667 = vmatpush.msra.mxu2 %v595_v55  ;;  %871 = vmatpush.msrb.mxu3 %v719_v27 }
 0x303   :  { %863 = vmatmul.msk.f32.vlgmr.msra.gmra.mxu2 %vm221_vm0, %v1238_v60 }
 0x304   :  { %872 = vmatpush.msrb.mxu3 %v718_v30 }
 0x305   :  { %866 = vmatmul.msk.f32.gmra.mxu3 %vm221_vm0, %v1244_v5 }
 0x306   :  { %873 = vmatpush.msrb.mxu3 %v717_v33 }
 0x308   :  { %874 = vmatpush.msrb.mxu3 %v716_v35 }
 0x30a   :  { %875 = vmatpush.msrb.mxu3 %v715_v39 }
 0x30b   :  { %864 = vmatmul.msk.f32.gmra.mxu2 %vm221_vm0, %v1244_v5 }
 0x30c   :  { %876 = vmatpush.msrb.mxu3 %v714_v42 }
 0x30e   :  { %877 = vmatpush.msrb.mxu3 %v713_v45 }
 0x310   :  { %878 = vmatpush.msrb.mxu3 %v712_v49 }
 0x312   :  { %879 = vmatpush.msrb.mxu3 %v711_v53 }
 0x314   :  { %880 = vmatpush.msrb.mxu3 %v710_v56 }
 0x316   :  { %881 = vmatpush.msrb.mxu3 %v709_v58 }
 0x318   :  { %882 = vmatpush.msrb.mxu3 %v708_v61 }
 0x31a   :  { %883 = vmatpush.msrb.mxu3 %v707_v63 }
 0x31c   :  { %884 = vmatpush.msrb.mxu3 %v706_v1 }
 0x380   :  { %v692_v6 = vpop.f32.mrf.mxu3 }
 0x381   :  { %v693_v7 = vadd.f32 %v692_v6, %v649_v4 }
 0x383   :  { %914 = vtanh.f32 %v693_v7 }
 0x386   :  { %v669_v9 = vpop.f32.mrf.mxu2 }
 0x387   :  { %v670_v10 = vadd.f32 %v669_v9, %v648_v8 }
 0x388   :  { %v695_v11 = vpop.f32.mrf.mxu3 }
 0x389   :  { %v915_v12 = vpop.eup %914  ;;  %916 = vtanh.f32 %v670_v10  ;;  %v696_v13 = vadd.f32 %v695_v11, %v649_v4 }
 0x38a   :  { %703 = vst [vmem:[#allocation13 + $0x8] sm:$0xff] %v915_v12  ;;  %777 = vmatmul.f32.vlgmr.msrb.gmra.mxu1 %v915_v12 }
 0x38b   :  { %918 = vtanh.f32 %v696_v13 }
 0x38e   :  { %v672_v14 = vpop.f32.mrf.mxu2 }
 0x38f   :  { %v917_v15 = vpop.eup %916  ;;  %v673_v16 = vadd.f32 %v672_v14, %v648_v8 }
 0x390   :  { %702 = vst [vmem:[#allocation13] sm:$0xff] %v917_v15  ;;  %754 = vmatmul.f32.vlgmr.msrb.gmra.mxu0 %v917_v15 }
 0x391   :  { %v919_v17 = vpop.eup %918  ;;  %920 = vtanh.f32 %v673_v16 }
 0x392   :  { %705 = vst [vmem:[#allocation13 + $0x18] sm:$0xff] %v919_v17  ;;  %780 = vmatmul.f32.gmra.mxu1 %v919_v17 }
 0x397   :  { %v921_v18 = vpop.eup %920 }
 0x398   :  { %704 = vst [vmem:[#allocation13 + $0x10] sm:$0xff] %v921_v18  ;;  %757 = vmatmul.f32.vlgmr.msrb.gmra.mxu3 %v921_v18 }
 0x399   :  { %827 = dma.vmem_to_hbm [thread:$0]  %s820_s14, 512, %s822_s4, [#allocation4], %s1134_s12, %s1134_s12, %s1135_s13  }
 0x407   :  { %v778_v19 = vpop.f32.mrf.mxu1 }
 0x40d   :  { %v755_v21 = vpop.f32.mrf.mxu0 }
 0x40e   :  { %v779_v24 = vadd.f32 %v778_v19, %v755_v21 }
 0x40f   :  { %v781_v20 = vpop.f32.mrf.mxu1 }
 0x41b   :  { %v758_v22 = vpop.f32.mrf.mxu3 }
 0x41c   :  { %v782_v23 = vadd.f32 %v781_v20, %v758_v22 }
 0x41e   :  { %802 = vmatpush.msrb.mxu2 %v782_v23 }
 0x420   :  { %803 = vmatpush.msrb.mxu2 %v779_v24 }
 0x421   :  { %867 = vmatmul.msk.f32.vlgmr.msrb.gmra.mxu2 %vm221_vm0, %v1238_v60 }
 0x429   :  { %868 = vmatmul.msk.f32.gmra.mxu2 %vm221_vm0, %v1244_v5 }
 0x4a4   :  { %v805_v60 = vpop.f32.mrf.mxu2 }
 0x4a5   :  { %v806_v26 = vadd.f32 %v897_v25, %v805_v60 }
 0x4a7   :  { %922 = vtanh.f32 %v806_v26 }
 0x4ac   :  { %v808_v5 = vpop.f32.mrf.mxu2 }
 0x4ad   :  { %v923_v27 = vpop.eup %922  ;;  %v809_v28 = vadd.f32 %v897_v25, %v808_v5 }
 0x4ae   :  { %813 = vst [vmem:[#allocation14] sm:$0xff] %v923_v27 }
 0x4af   :  { %924 = vtanh.f32 %v809_v28 }
 0x4b5   :  { %v925_v29 = vpop.eup %924 }
 0x4b6   :  { %814 = vst [vmem:[#allocation14 + $0x8] sm:$0xff] %v925_v29 }
 0x4b7   :  { %840 = dma.vmem_to_hbm [thread:$0]  %s833_s10, 256, %s835_s21, [#allocation15], %s1131_s22, %s1131_s22, %s1132_s23  }
 0x4b8   :  { %1126 = dma.done.wait [#allocation4], 512  }
 0x4b9   :  { %1127 = vsyncadd [#allocation4], 4294966784 }
 0x4ba   :  { %1128 = dma.done.wait [#allocation15], 256  }
 0x4bb   :  { %1129 = vsyncadd [#allocation15], 4294967040 }
 0x4bc   :  { %849 = vsyncpa [#allocation3], 1 }
 0x4bd   :  { %850 = vsyncpa [#allocation6], 1 }
 0x4be   :  { %851 = vsyncpa [#allocation9], 1 }
 0x4bf   :  { %852 = vsyncpa [#allocation12], 1 }
 0x4c0   :  { %853 = vsyncpa [#allocation4], 1 }
 0x4c1   :  { %854 = vsyncpa [#allocation15], 1 }

</bundles_post_ra>
